<compile_context>
chip_gen: v6e
topology: v6e:2x2x1
jax: 0.10.0
libtpu: 0.0.40
codegen_flags: <defaults>
</compile_context>

<pallas_src>
import functools

import jax
import jax.numpy as jnp
from jax import lax
from jax.experimental import pallas as pl
from jax.experimental.pallas import tpu as pltpu


def _spatial_gather_kernel(probs_ref, feats_ref, out_ref,
                           m_sc, l_sc, acc_sc,
                           *, scale, n_total, tile_n, needs_mask):
    # probs_ref: (K, TN)  feats_ref: (C, TN)  out_ref: (K, C)
    n = pl.program_id(1)

    @pl.when(n == 0)
    def _init():
        m_sc[...] = jnp.full_like(m_sc, -jnp.inf)
        l_sc[...] = jnp.zeros_like(l_sc)
        acc_sc[...] = jnp.zeros_like(acc_sc)

    p = probs_ref[...].astype(jnp.float32)               # (K, TN) f32 softmax math
    if scale != 1.0:                                     # static: skip when scale==1
        p = p * scale

    f = feats_ref[...]                                   # native dtype -> MXU operand

    if needs_mask:                                       # static: only when N % TN != 0
        valid = n_total - n * tile_n                     # scalar, >= 1
        col_p = lax.broadcasted_iota(jnp.int32, p.shape, 1)
        p = jnp.where(col_p < valid, p, -jnp.inf)        # padded lanes -> exp() == 0
        col_f = lax.broadcasted_iota(jnp.int32, f.shape, 1)
        f = jnp.where(col_f < valid, f, jnp.zeros_like(f))

    # --- online softmax across the tiled spatial axis ---
    m_prev = m_sc[...]                                   # (K, 1)
    m_new = jnp.maximum(m_prev, jnp.max(p, axis=-1, keepdims=True))
    alpha = jnp.exp(m_prev - m_new)                      # (K, 1) rescale factor
    e = jnp.exp(p - m_new)                               # (K, TN) unnormalized weights
    l_sc[...] = alpha * l_sc[...] + jnp.sum(e, axis=-1, keepdims=True)

    # (K, TN) x (C, TN)^T -> (K, C); input-dtype operands, f32 accumulation.
    part = lax.dot_general(
        e.astype(f.dtype), f,
        dimension_numbers=(((1,), (1,)), ((), ())),
        preferred_element_type=jnp.float32,
    )
    acc_sc[...] = alpha * acc_sc[...] + part
    m_sc[...] = m_new

    @pl.when(n == pl.num_programs(1) - 1)
    def _finalize():
        # Deferred normalization: only K*C divides instead of K*N.
        inv = pl.reciprocal(l_sc[...], approx=False)     # (K, 1), negligible cost
        out_ref[...] = (acc_sc[...] * inv).astype(out_ref.dtype)


def _choose_tile_n(n, c, itemsize):
    """Pick a spatial tile so the double-buffered feats tile stays well under
    the smallest default scoped-VMEM limit (16 MiB on v5e); ~4 MiB per tile."""
    budget_bytes = 4 * 1024 * 1024
    tn = budget_bytes // max(1, c * itemsize)
    tn = max(128, (tn // 128) * 128)                     # keep lane alignment
    return n if n <= tn else tn


def spatial_gather(feats, probs, scale=1.0, tile_n=None):
    """feats: (B, C, H, W), probs: (B, K, H, W) -> (B, C, K, 1)."""
    B, C, H, W = feats.shape
    Bp, K, Hp, Wp = probs.shape
    assert (B, H, W) == (Bp, Hp, Wp)
    N = H * W

    feats_flat = feats.reshape(B, C, N)
    probs_flat = probs.reshape(B, K, N)

    tn = tile_n if tile_n is not None else _choose_tile_n(N, C, feats.dtype.itemsize)
    n_tiles = pl.cdiv(N, tn)
    needs_mask = (N % tn) != 0

    kernel = functools.partial(
        _spatial_gather_kernel,
        scale=float(scale), n_total=N, tile_n=tn, needs_mask=needs_mask)

    itemsize = feats.dtype.itemsize
    cost = pl.CostEstimate(
        flops=2 * B * K * C * N,
        transcendentals=B * K * N,
        bytes_accessed=(B * K * N * probs.dtype.itemsize
                        + B * C * N * itemsize
                        + B * K * C * itemsize),
    )

    out_kc = pl.pallas_call(
        kernel,
        out_shape=jax.ShapeDtypeStruct((B, K, C), feats.dtype),
        grid_spec=pltpu.PrefetchScalarGridSpec(
            num_scalar_prefetch=0,
            grid=(B, n_tiles),
            in_specs=[
                pl.BlockSpec((pl.Squeezed(), K, tn), lambda b, n: (b, 0, n)),
                pl.BlockSpec((pl.Squeezed(), C, tn), lambda b, n: (b, 0, n)),
            ],
            out_specs=pl.BlockSpec((pl.Squeezed(), K, C), lambda b, n: (b, 0, 0)),
            scratch_shapes=[
                pltpu.VMEM((K, 1), jnp.float32),   # running max
                pltpu.VMEM((K, 1), jnp.float32),   # running denominator
                pltpu.VMEM((K, C), jnp.float32),   # unnormalized context accumulator
            ],
        ),
        compiler_params=pltpu.CompilerParams(
            dimension_semantics=("parallel", "arbitrary"),
        ),
        cost_estimate=cost,
    )(probs_flat, feats_flat)

    # Tiny (B, K, C) -> (B, C, K, 1) transpose done by XLA outside the kernel.
    return jnp.transpose(out_kc, (0, 2, 1))[..., None]


def _reference(feats, probs, scale=1.0):
    B, C, H, W = feats.shape
    K = probs.shape[1]
    p = probs.reshape(B, K, H * W)
    f = feats.reshape(B, C, H * W).transpose(0, 2, 1)        # (B, HW, C)
    p = jax.nn.softmax(scale * p, axis=2)
    ctx = jnp.einsum("bkn,bnc->bkc", p, f)                    # (B, K, C)
    return ctx.transpose(0, 2, 1)[..., None]                  # (B, C, K, 1)


if __name__ == "__main__":
    key = jax.random.PRNGKey(0)
    k1, k2, k3, k4 = jax.random.split(key, 4)

    # Test 1: single-tile path (N fits one tile).
    B, C, K, H, W = 2, 32, 4, 16, 16
    feats = jax.random.normal(k1, (B, C, H, W), dtype=jnp.float32)
    probs = jax.random.normal(k2, (B, K, H, W), dtype=jnp.float32)
    out = jax.block_until_ready(spatial_gather(feats, probs, scale=1.0))
    ref = _reference(feats, probs, scale=1.0)
    assert out.shape == (B, C, K, 1)
    assert jnp.allclose(out, ref, atol=1e-4, rtol=1e-4)

    # Test 2: tiled spatial axis with a masked (ragged) last tile + scale != 1.
    B2, C2, K2, H2, W2 = 2, 32, 4, 16, 10            # N = 160, tile_n = 128 -> 2 tiles
    feats2 = jax.random.normal(k3, (B2, C2, H2, W2), dtype=jnp.float32)
    probs2 = jax.random.normal(k4, (B2, K2, H2, W2), dtype=jnp.float32)
    out2 = jax.block_until_ready(spatial_gather(feats2, probs2, scale=0.5, tile_n=128))
    ref2 = _reference(feats2, probs2, scale=0.5)
    assert out2.shape == (B2, C2, K2, 1)
    assert jnp.allclose(out2, ref2, atol=1e-4, rtol=1e-4)

    print("KERNEL_OK")
</pallas_src>

<mosaic_0001>
module attributes {stable_mosaic.version = 11 : i64} {
  func.func @_spatial_gather_kernel(%arg0: i32, %arg1: i32, %arg2: memref<1x4x256xf32, #tpu.memory_space<vmem>>, %arg3: memref<1x32x256xf32, #tpu.memory_space<vmem>>, %arg4: memref<1x4x32xf32, #tpu.memory_space<vmem>>, %arg5: memref<4x1xf32, #tpu.memory_space<vmem>>, %arg6: memref<4x1xf32, #tpu.memory_space<vmem>>, %arg7: memref<4x32xf32, #tpu.memory_space<vmem>>) attributes {dimension_semantics = [#tpu.dimension_semantics<parallel>, #tpu.dimension_semantics<arbitrary>], iteration_bounds = array<i64: 2, 1>, scalar_prefetch = 0 : i64, scratch_operands = 3 : i64, tpu.core_type = #tpu.core_type<tc>, window_params = [{transform_indices = @transform_0, window_bounds = array<i64: 1, 4, 256>}, {transform_indices = @transform_1, window_bounds = array<i64: 1, 32, 256>}, {transform_indices = @transform_2, window_bounds = array<i64: 1, 4, 32>}]} {
    %c0_i32 = arith.constant 0 : i32
    %0 = arith.cmpi eq, %arg1, %c0_i32 : i32
    %1 = arith.extui %0 : i1 to i32
    %c0_i32_0 = arith.constant 0 : i32
    %2 = arith.cmpi ne, %1, %c0_i32_0 : i32
    scf.if %2 {
      %cst_22 = arith.constant 0xFF800000 : f32
      %32 = vector.broadcast %cst_22 : f32 to vector<4x1xf32>
      %c0_23 = arith.constant 0 : index
      %c0_24 = arith.constant 0 : index
      %33 = vector.load %arg5[%c0_23, %c0_24] : memref<4x1xf32, #tpu.memory_space<vmem>>, vector<4x1xf32>
      tpu.vector_store %arg5[%c0_23, %c0_24], %32 {strides = array<i32>} : memref<4x1xf32, #tpu.memory_space<vmem>>, vector<4x1xf32>,
      %cst_25 = arith.constant 0.000000e+00 : f32
      %34 = vector.broadcast %cst_25 : f32 to vector<4x1xf32>
      %c0_26 = arith.constant 0 : index
      %c0_27 = arith.constant 0 : index
      %35 = vector.load %arg6[%c0_26, %c0_27] : memref<4x1xf32, #tpu.memory_space<vmem>>, vector<4x1xf32>
      tpu.vector_store %arg6[%c0_26, %c0_27], %34 {strides = array<i32>} : memref<4x1xf32, #tpu.memory_space<vmem>>, vector<4x1xf32>,
      %cst_28 = arith.constant 0.000000e+00 : f32
      %36 = vector.broadcast %cst_28 : f32 to vector<4x32xf32>
      %c0_29 = arith.constant 0 : index
      %c0_30 = arith.constant 0 : index
      %37 = vector.load %arg7[%c0_29, %c0_30] : memref<4x32xf32, #tpu.memory_space<vmem>>, vector<4x32xf32>
      tpu.vector_store %arg7[%c0_29, %c0_30], %36 {strides = array<i32>} : memref<4x32xf32, #tpu.memory_space<vmem>>, vector<4x32xf32>,
    } else {
    }
    %c0 = arith.constant 0 : index
    %c0_1 = arith.constant 0 : index
    %c0_2 = arith.constant 0 : index
    %3 = vector.load %arg2[%c0, %c0_1, %c0_2] : memref<1x4x256xf32, #tpu.memory_space<vmem>>, vector<1x4x256xf32>
    %4 = vector.shape_cast %3 : vector<1x4x256xf32> to vector<4x256xf32>
    %c0_3 = arith.constant 0 : index
    %c0_4 = arith.constant 0 : index
    %c0_5 = arith.constant 0 : index
    %5 = vector.load %arg3[%c0_3, %c0_4, %c0_5] : memref<1x32x256xf32, #tpu.memory_space<vmem>>, vector<1x32x256xf32>
    %6 = vector.shape_cast %5 : vector<1x32x256xf32> to vector<32x256xf32>
    %c0_6 = arith.constant 0 : index
    %c0_7 = arith.constant 0 : index
    %7 = vector.load %arg5[%c0_6, %c0_7] : memref<4x1xf32, #tpu.memory_space<vmem>>, vector<4x1xf32>
    %cst = arith.constant dense<0xFF800000> : vector<4xf32>
    %8 = vector.multi_reduction <maximumf>, %4, %cst [1] : vector<4x256xf32> to vector<4xf32>
    %9 = vector.shape_cast %8 : vector<4xf32> to vector<4x1xf32>
    %10 = arith.maximumf %7, %9 : vector<4x1xf32>
    %11 = arith.subf %7, %10 : vector<4x1xf32>
    %12 = math.exp %11 : vector<4x1xf32>
    %13 = vector.broadcast %10 : vector<4x1xf32> to vector<4x256xf32>
    %14 = arith.subf %4, %13 : vector<4x256xf32>
    %15 = math.exp %14 : vector<4x256xf32>
    %c0_8 = arith.constant 0 : index
    %c0_9 = arith.constant 0 : index
    %16 = vector.load %arg6[%c0_8, %c0_9] : memref<4x1xf32, #tpu.memory_space<vmem>>, vector<4x1xf32>
    %17 = arith.mulf %12, %16 : vector<4x1xf32>
    %cst_10 = arith.constant dense<0.000000e+00> : vector<4xf32>
    %18 = vector.multi_reduction <add>, %15, %cst_10 [1] : vector<4x256xf32> to vector<4xf32>
    %19 = vector.shape_cast %18 : vector<4xf32> to vector<4x1xf32>
    %20 = arith.addf %17, %19 : vector<4x1xf32>
    %c0_11 = arith.constant 0 : index
    %c0_12 = arith.constant 0 : index
    %21 = vector.load %arg6[%c0_11, %c0_12] : memref<4x1xf32, #tpu.memory_space<vmem>>, vector<4x1xf32>
    tpu.vector_store %arg6[%c0_11, %c0_12], %20 {strides = array<i32>} : memref<4x1xf32, #tpu.memory_space<vmem>>, vector<4x1xf32>,
    %cst_13 = arith.constant dense<0.000000e+00> : vector<4x32xf32>
    %22 = tpu.matmul %15, %6, %cst_13 {dimension_numbers = #tpu.dot_dimension_numbers<[1], [1], [0], [0], [0, 0, 1, 0], [], []>} : vector<4x256xf32>, vector<32x256xf32>, vector<4x32xf32> -> vector<4x32xf32>
    %c0_14 = arith.constant 0 : index
    %c0_15 = arith.constant 0 : index
    %23 = vector.load %arg7[%c0_14, %c0_15] : memref<4x32xf32, #tpu.memory_space<vmem>>, vector<4x32xf32>
    %24 = vector.broadcast %12 : vector<4x1xf32> to vector<4x32xf32>
    %25 = arith.mulf %24, %23 : vector<4x32xf32>
    %26 = arith.addf %25, %22 : vector<4x32xf32>
    %c0_16 = arith.constant 0 : index
    %c0_17 = arith.constant 0 : index
    %27 = vector.load %arg7[%c0_16, %c0_17] : memref<4x32xf32, #tpu.memory_space<vmem>>, vector<4x32xf32>
    tpu.vector_store %arg7[%c0_16, %c0_17], %26 {strides = array<i32>} : memref<4x32xf32, #tpu.memory_space<vmem>>, vector<4x32xf32>,
    %c0_18 = arith.constant 0 : index
    %c0_19 = arith.constant 0 : index
    %28 = vector.load %arg5[%c0_18, %c0_19] : memref<4x1xf32, #tpu.memory_space<vmem>>, vector<4x1xf32>
    tpu.vector_store %arg5[%c0_18, %c0_19], %10 {strides = array<i32>} : memref<4x1xf32, #tpu.memory_space<vmem>>, vector<4x1xf32>,
    %c0_i32_20 = arith.constant 0 : i32
    %29 = arith.cmpi eq, %arg1, %c0_i32_20 : i32
    %30 = arith.extui %29 : i1 to i32
    %c0_i32_21 = arith.constant 0 : i32
    %31 = arith.cmpi ne, %30, %c0_i32_21 : i32
    scf.if %31 {
      %c0_22 = arith.constant 0 : index
      %c0_23 = arith.constant 0 : index
      %32 = vector.load %arg6[%c0_22, %c0_23] : memref<4x1xf32, #tpu.memory_space<vmem>>, vector<4x1xf32>
      %33 = tpu.reciprocal %32 : vector<4x1xf32> -> vector<4x1xf32>
      %c0_24 = arith.constant 0 : index
      %c0_25 = arith.constant 0 : index
      %34 = vector.load %arg7[%c0_24, %c0_25] : memref<4x32xf32, #tpu.memory_space<vmem>>, vector<4x32xf32>
      %35 = vector.broadcast %33 : vector<4x1xf32> to vector<4x32xf32>
      %36 = arith.mulf %34, %35 : vector<4x32xf32>
      %c0_26 = arith.constant 0 : index
      %c0_27 = arith.constant 0 : index
      %c0_28 = arith.constant 0 : index
      %37 = vector.load %arg4[%c0_26, %c0_27, %c0_28] : memref<1x4x32xf32, #tpu.memory_space<vmem>>, vector<1x4x32xf32>
      %38 = vector.shape_cast %37 : vector<1x4x32xf32> to vector<4x32xf32>
      %39 = vector.shape_cast %36 : vector<4x32xf32> to vector<1x4x32xf32>
      tpu.vector_store %arg4[%c0_26, %c0_27, %c0_28], %39 {strides = array<i32>} : memref<1x4x32xf32, #tpu.memory_space<vmem>>, vector<1x4x32xf32>,
    } else {
    }
    return
  }
  func.func @transform_0(%arg0: i32, %arg1: i32) -> (i32, i32, i32) {
    %c0_i32 = arith.constant 0 : i32
    %c0_i32_0 = arith.constant 0 : i32
    return %arg0, %c0_i32, %arg1 : i32, i32, i32
  }
  func.func @transform_1(%arg0: i32, %arg1: i32) -> (i32, i32, i32) {
    %c0_i32 = arith.constant 0 : i32
    %c0_i32_0 = arith.constant 0 : i32
    return %arg0, %c0_i32, %arg1 : i32, i32, i32
  }
  func.func @transform_2(%arg0: i32, %arg1: i32) -> (i32, i32, i32) {
    %c0_i32 = arith.constant 0 : i32
    %c0_i32_0 = arith.constant 0 : i32
    %c0_i32_1 = arith.constant 0 : i32
    return %arg0, %c0_i32, %c0_i32_0 : i32, i32, i32
  }
}

</mosaic_0001>

<bundles_post_ra>
// kernel: tpu_custom_call.1
= control target key start
LH: loop header
LB: loop body
LE: loop exit
PB: predicated region body
PF: predicated region fallthrough
CT: control target
= control target key end

     0   :  { %7 = vsyncpa [#allocation6], 0  ;;  %s951_s0 = inlined_call_operand.hbm [shape: f32[2,4,256], index: 0, kind: input, shape index: {}]   ;;  %s952_s1 = inlined_call_operand.hbm [shape: f32[2,32,256], index: 1, kind: input, shape index: {}]   ;;  %s953_s2 = inlined_call_operand.hbm [shape: f32[2,4,32], index: 2, kind: output, shape index: {}]  }
   0x1   :  { %9 = vsyncpa [#allocation6 + $0x1], 0 }
   0x2   :  { %10 = vsyncpa [#allocation9], 0 }
   0x3   :  { %12 = vsyncpa [#allocation9 + $0x1], 0 }
   0x4   :  { %13 = vsyncpa [#allocation7], 0 }
   0x5   :  { %15 = vsyncpa [#allocation7 + $0x1], 0  ;;  %s765_s9 = smov 0   ;;  %s767_s10 = smov 0  }
   0x6   :  { %s769_s11 = smov 0   ;;  %s771_s12 = smov 0  }
   0x7   :  { %s773_s13 = smov 0   ;;  %s775_s14 = smov 0  }
   0x8 LB: > { %s497_s15 = sadd.s32 4294967295, %s739_s14   ;;  %s498_s16 = sadd.s32 4294967294, %s739_s14   ;;  %s739_s14 = sphi %s775_s14, %s21_s14   ;;  %s735_s13 = sphi %s773_s13, %s965_s13   ;;  %s731_s12 = sphi %s771_s12, %s964_s12   ;;  %s727_s11 = sphi %s769_s11, %s963_s11   ;;  %s723_s10 = sphi %s767_s10, %s962_s10   ;;  %s719_s9 = sphi %s765_s9, %s961_s9  }
   0x9   : > { %s33_s17 = sadd.s32 1, %s735_s13  ;;  %s42_s18 = sadd.s32 1, %s727_s11 }
   0xa   : > { %p35_p0 = scmp.ge.s32.totalorder %s33_s17, 2  ;;  %p49_p1 = scmp.ne.s32.totalorder %s727_s11, %s723_s10 }
   0xb   : > { %p50_p2 = scmp.eq.s32.totalorder %s739_s14, 0  ;;  %p55_p3 = scmp.ne.s32.totalorder %s723_s10, %s719_s9 }
   0xc   : > { %s967_s17 = smov (%p35_p0, %s33_s17), 0  ;;  %p56_p5 = scmp.eq.s32.totalorder %s497_s15, 0 }
   0xd   : > { %p806_p4 = por %p50_p2, %p49_p1  ;;  %s37_s20 = ssub.s32 %s735_s13, %s967_s17 }
   0xe   : > { %p107_p6 = scmp.eq.s32.totalorder %s497_s15, 1  ;;  %p40_p7 = scmp.eq.s32.totalorder %s37_s20, 0 }
   0xf   : > { %p812_p8 = por %p56_p5, %p55_p3  ;;  %p113_p10 = scmp.eq.s32.totalorder %s498_s16, 1 }
  0x10   : > { %p816_p9 = por %p107_p6, %p49_p1  ;;  %p534_p13 = scmp.lt.s32.totalorder %s739_s14, 2 }
  0x11   : > { %s821_s23 = scalar_select %p40_p7, %s727_s11, %s42_s18  }
  0x12   : > { %p823_p11 = por %p113_p10, %p55_p3  ;;  %s830_s25 = sand.u32 1, %s727_s11  }
  0x13   : > { %s501_s26 = sshll.u32 %s830_s25, 3  ;;  %s515_s27 = sshll.u32 %s735_s13, 7 }
  0x14   : > { %s145_s30 = scalar_lea.hbm %s951_s0, %s515_s27  ;;  %s137_s3 = scalar_lea.vmem [#allocation5], %s501_s26 }
  0x15   : > { %s147_s4 = sshll.u32 %s137_s3, 4  ;;  %p839_p0 = pnand %p534_p13, %p806_p4  ;;  %s148_s4 = int_to_ptr.vmem [resolvable:$true] %s147_s4 }
  0x16   : > { %p507_p1 = scmp.ge.s32.totalorder %s739_s14, 1  ;;  %p175_p2 = scmp.lt.s32.totalorder %s739_s14, 3 }
  0x17   : > { %s134_s6 = scalar_lea.sflag [#allocation6], %s830_s25  ;;  %p601_p3 = pneg %p839_p0 }
  0x18   : > { %s612_s7 = scalar_lea.vmem %s148_s4, 128  ;;  %s741_s8 = smov [#allocation5]  }
  0x19   : > { %p613_p5 = scmp.ne.s32.totalorder %s148_s4, %s612_s7  ;;  %s617_s15 = sshll.u32 %s741_s8, 4  ;;  %s618_s15 = int_to_ptr.vmem [resolvable:$false] %s617_s15 }
  0x1a   : > { %s619_s16 = scalar_lea.vmem %s618_s15, 256  ;;  %p620_p4 = scmp.lt.s32.totalorder %s148_s4, %s618_s15 }
  0x1b   : > { %p615_p6 = pnand %p613_p5, %p601_p3  ;;  %p621_p10 = scmp.lt.s32.totalorder %s619_s16, %s612_s7 }
  0x1d   : > { %p616_p7 = pneg %p615_p6  ;;  %p622_p13 = por %p621_p10, %p620_p4 }
  0x1f   : > { %p623_p12 = pnand %p622_p13, %p616_p7 }
  0x21   : > { %626 = shalt.err (!%p623_p12)
}
  0x22   : > { %526 = dma.hbm_to_vmem [thread:$0]  (!%p839_p0), %s145_s30, 128, %s148_s4, %s134_s6  }
  0x23   : > { %p857_p5 = pnand %p507_p1, %p175_p2  ;;  %s504_s19 = sshll.u32 %s830_s25, 6 }
  0x24   : > { %s516_s20 = sshll.u32 %s735_s13, 10  ;;  %s158_s29 = scalar_lea.vmem [#allocation8], %s504_s19 }
  0x25   : > { %s166_s28 = scalar_lea.hbm %s952_s1, %s516_s20  ;;  %s167_s3 = sshll.u32 %s158_s29, 4  ;;  %s168_s3 = int_to_ptr.vmem [resolvable:$true] %s167_s3 }
  0x26   : > { %s155_s7 = scalar_lea.sflag [#allocation9], %s830_s25  ;;  %s640_s8 = scalar_lea.vmem %s168_s3, 1024 }
  0x27   : > { %p641_p12 = scmp.ne.s32.totalorder %s168_s3, %s640_s8  ;;  %s742_s30 = smov [#allocation8]  }
  0x28   : > { %s645_s4 = sshll.u32 %s742_s30, 4  ;;  %s646_s4 = int_to_ptr.vmem [resolvable:$false] %s645_s4 }
  0x29   : > { %p643_p6 = pnand %p641_p12, %p601_p3  ;;  %s647_s6 = scalar_lea.vmem %s646_s4, 2048 }
  0x2a   : > { %p648_p1 = scmp.lt.s32.totalorder %s168_s3, %s646_s4  ;;  %p649_p2 = scmp.lt.s32.totalorder %s647_s6, %s640_s8 }
  0x2b   : > { %p644_p7 = pneg %p643_p6 }
  0x2c   : > { %p650_p4 = por %p649_p2, %p648_p1 }
  0x2e   : > { %p651_p10 = pnand %p650_p4, %p644_p7 }
  0x30   : > { %654 = shalt.err (!%p651_p10)
}
  0x31   : > { %s743_s15 = smov 256   ;;  %s744_s16 = smov 16  }
  0x32   : > { %529 = dma.hbm_to_vmem [thread:$0]  (!%p839_p0), %s166_s28, 1024, %s168_s3, %s155_s7, %s743_s15, %s743_s15, %s744_s16  }
  0x33   : > { %179 = sbr.rel (%p857_p5) target bundleno = 656 (0x290), region = 28  ;;  %s875_s25 = sand.u32 (!%p857_p5), 1, %s723_s10  }
  0x34   : > { %s508_s19 = sshll.u32 (!%p857_p5), %s875_s25, 3  ;;  %s182_s20 = scalar_lea.sflag (!%p857_p5), [#allocation6], %s875_s25 }
  0x35   : > { %s185_s26 = scalar_lea.vmem (!%p857_p5), [#allocation5], %s508_s19 }
  0x38   : > { %706 = dma.done.wait (%p812_p8), %s182_s20, 128  }
  0x39   : > { %708 = vsyncadd (%p812_p8), %s182_s20, 4294967168  ;;  %s509_s5 = sshll.u32 %s875_s25, 6  ;;  %s191_s18 = scalar_lea.sflag [#allocation9], %s875_s25 }
  0x3a   : > { %s885_s27 = scalar_lea.vmem [#allocation8], %s509_s5 }
  0x3b   : > { %710 = dma.done.wait (%p812_p8), %s191_s18, 1024  }
  0x3c   : > { %712 = vsyncadd (%p812_p8), %s191_s18, 4294966272  ;;  %vm226_vm0 = vcmask 3072   ;;  %v745_v0 = vmov -inf   ;;  %vm244_vm1 = vcmask 1043456   ;;  %v231_v1 = vld [vmem:[%s185_s26] sm:$0xff]  ;;  %v746_v6 = vmov 0  }
  0x3d   : > { %227 = vst.msk [vmem:[#allocation2] sm:$0xf] %vm226_vm0, %v745_v0  ;;  %v242_v2 = vcombine.high %v231_v1, %v231_v1  ;;  %v245_v3 = vsel %vm244_vm1, %v231_v1, -inf  ;;  %590 = vset.pattern.permute.xlu0 %v746_v6  ;;  %591 = vset.pattern.permute.xlu1 %v746_v6  ;;  %v747_v7 = vmov 0.0   ;;  %v239_v12 = vld [vmem:[%s885_s27 + $0x38] sm:$0xff]  ;;  %v238_v13 = vld [vmem:[%s885_s27 + $0x30] sm:$0xff]  ;;  %v261_v22 = vlaneseq }
  0x3e   : > { %228 = vst.msk [vmem:[#allocation3] sm:$0xf] %vm226_vm0, %v747_v7  ;;  %v237_v14 = vld [vmem:[%s885_s27 + $0x28] sm:$0xff]  ;;  %306 = vmatprep.subr.mxu0 %v239_v12  ;;  %v236_v15 = vld [vmem:[%s885_s27 + $0x20] sm:$0xff]  ;;  %v235_v16 = vld [vmem:[%s885_s27 + $0x18] sm:$0xff]  ;;  %vm229_vm2 = vcmask 257024  }
  0x3f   : > { %v246_v4 = vsel %vm244_vm1, %v242_v2, -inf  ;;  %307 = vmatpush1.xpose.msra.mxu0 %v238_v13  ;;  %v234_v17 = vld [vmem:[%s885_s27 + $0x10] sm:$0xff]  ;;  %v233_v18 = vld [vmem:[%s885_s27 + $0x8] sm:$0xff]  ;;  %v232_v19 = vld [vmem:[%s885_s27] sm:$0xff]  ;;  %v748_v20 = vmov 839922192  }
  0x40   : > { %v247_v5 = vmax.f32 %v245_v3, %v246_v4  ;;  %308 = vmatprep.subr.mxu0 %v237_v14  ;;  %v259_v21 = vunpack.c.l.s4 %v748_v20  ;;  %v262_v24 = vshrl.u32 %v261_v22, 7  ;;  %230 = vst.msk [vmem:[#allocation4] sm:$0xf] %vm229_vm2, %v747_v7  ;;  %s510_s21 = sshll.u32 %s875_s25, 2  ;;  %s512_s28 = sshll.u32 %s731_s12, 6 }
  0x41   : > { %s219_s29 = scalar_lea.vmem [#allocation10], %s510_s21  ;;  %s388_s30 = scalar_lea.hbm %s953_s2, %s512_s28 }
  0x42   : > { %248 = vmax.xlane.f32.xlu0 %v247_v5  ;;  %v260_v23 = vunpack.c.0.s8 %v259_v21  ;;  %s390_s3 = sshll.u32 %s219_s29, 4  ;;  %s377_s4 = scalar_lea.sflag [#allocation7], %s875_s25  ;;  %s391_s3 = int_to_ptr.vmem [resolvable:$true] %s390_s3 }
  0x43   : > { %309 = vmatpush1.xpose.msra.mxu0 %v236_v15  ;;  %s655_s6 = scalar_lea.vmem %s391_s3, 64  ;;  %s749_s15 = smov [#allocation10]  }
  0x44   : > { %v240_v8 = vld [vmem:[#allocation2] sm:$0xf]  ;;  %310 = vmatprep.subr.mxu0 %v235_v16  ;;  %v263_v25 = vsub.s32 %v260_v23, %v262_v24  ;;  %p656_p8 = scmp.ne.s32.totalorder %s391_s3, %s655_s6  ;;  %s659_s12 = sshll.u32 %s749_s15, 4  ;;  %s660_s12 = int_to_ptr.vmem [resolvable:$false] %s659_s12 }
  0x45   : > { %v269_v37 = vld [vmem:[#allocation3] sm:$0xf]  ;;  %s661_s16 = scalar_lea.vmem %s660_s12, 128  ;;  %p662_p13 = scmp.lt.s32.totalorder %s391_s3, %s660_s12 }
  0x46   : > { %p657_p0 = pnand %p656_p8, %p816_p9  ;;  %p663_p5 = scmp.lt.s32.totalorder %s661_s16, %s655_s6 }
  0x47   : > { %311 = vmatpush1.xpose.msra.mxu0 %v234_v17  ;;  %v352_v43 = vld [vmem:[#allocation4] sm:$0xf] }
  0x48   : > { %312 = vmatprep.subr.mxu0 %v233_v18  ;;  %p658_p3 = pneg %p657_p0  ;;  %p664_p12 = por %p663_p5, %p662_p13 }
  0x4a   : > { %p665_p6 = pnand %p664_p12, %p658_p3 }
  0x4b   : > { %313 = vmatpush1.xpose.msra.mxu0 %v232_v19 }
  0xcb   : > { %v249_v9 = vpop.xlane.xlu0 %248 }
  0xcc   : > { %v250_v10 = vmax.f32 %v240_v8, %v249_v9 }
  0xce   : > { %v251_v11 = vsub.f32 %v240_v8, %v250_v10  ;;  %362 = vst.msk [vmem:[#allocation2] sm:$0xf] %vm226_vm0, %v250_v10  ;;  %256 = vperm.xlu0 %590, %v250_v10  }
  0xd0   : > { %v252_v35 = vmul.f32 1.442695, %v251_v11 }
 0x149   : > { %v257_v26 = vpop.permute.xlu0 %256 }
 0x14a   : > { %v264_v27 = vrot.slane %v257_v26, %v263_v25 }
 0x14c   : > { %v266_v28 = vsub.f32 %v231_v1, %v264_v27 }
 0x14e   : > { %v267_v29 = vmul.f32 1.442695, %v266_v28 }
 0x150   : > { %593 = vpow2.f32 %v267_v29 }
 0x151   : > { %595 = vpow2.f32 %v252_v35 }
 0x15d   : > { %v594_v30 = vpop.eup %593 }
 0x15e   : > { %v272_v31 = vcombine.high %v594_v30, %v594_v30  ;;  %v274_v32 = vsel %vm244_vm1, %v594_v30, 0.0  ;;  %v596_v36 = vpop.eup %595 }
 0x15f   : > { %v270_v38 = vmul.f32 %v596_v36, %v269_v37 }
 0x160   : > { %346 = vmatprep.mubr.f32.mxu0 %v272_v31  ;;  %v275_v33 = vsel %vm244_vm1, %v272_v31, 0.0 }
 0x161   : > { %347 = vmatmul.mubr.f32.vlgmr.msra.gmra.mxu0 %v594_v30  ;;  %v276_v34 = vadd.f32 %v275_v33, %v274_v32 }
 0x163   : > { %277 = vadd.xlane.f32.xlu1 %v276_v34 }
 0x174   : > { %355 = vperm.xlu1 %591, %v596_v36  }
 0x1ec   : > { %v278_v39 = vpop.xlane.xlu1 %277 }
 0x1ed   : > { %v279_v40 = vadd.f32 %v278_v39, %v270_v38 }
 0x1ef   : > { %281 = vst.msk [vmem:[#allocation3] sm:$0xf] %vm226_vm0, %v279_v40 }
 0x1f0   : > { %v356_v44 = vpop.permute.xlu1 %355 }
 0x1f1   : > { %v358_v45 = vmul.f32 %v356_v44, %v352_v43 }
 0x1f6   : > { %v366_v41 = vld [vmem:[#allocation3] sm:$0xf] }
 0x1f7   : > { %597 = vrcp.f32 %v366_v41 }
 0x204   : > { %v598_v42 = vpop.eup %597 }
 0x205   : > { %371 = vperm.xlu1 %591, %v598_v42  }
 0x221   : > { %v348_v46 = vpop.f32.mrf.mxu0 }
 0x222   : > { %v359_v47 = vadd.f32 %v358_v45, %v348_v46 }
 0x223   : > { %v350_v48 = vpop.f32.mrf.mxu0 }
 0x224   : > { %361 = vst.msk [vmem:[#allocation4] sm:$0xf] %vm229_vm2, %v359_v47 }
 0x22b   : > { %v368_v49 = vld [vmem:[#allocation4] sm:$0xf] }
 0x280   : > { %v372_v50 = vpop.permute.xlu1 %371 }
 0x281   : > { %v374_v51 = vmul.f32 %v372_v50, %v368_v49 }
 0x283   : > { %375 = vst.msk [vmem:[%s219_s29] sm:$0xf] %vm229_vm2, %v374_v51 }
 0x284   : > { %668 = shalt.err (!%p665_p6)
}
 0x285   : > { %s669_s19 = scalar_lea.hbm %s388_s30, 64  ;;  %s673_s26 = scalar_lea.hbm %s953_s2, 128 }
 0x286   : > { %p670_p7 = scmp.ne.s32.totalorder %s388_s30, %s669_s19  ;;  %p674_p4 = scmp.lt.s32.totalorder %s388_s30, %s953_s2 }
 0x287   : > { %p675_p10 = scmp.lt.s32.totalorder %s673_s26, %s669_s19 }
 0x288   : > { %p671_p1 = pnand %p670_p7, %p816_p9 }
 0x289   : > { %p676_p8 = por %p675_p10, %p674_p4 }
 0x28a   : > { %p672_p2 = pneg %p671_p1 }
 0x28c   : > { %p677_p0 = pnand %p676_p8, %p672_p2 }
 0x28e   : > { %680 = shalt.err (!%p677_p0)
}
 0x28f   : > { %521 = dma.vmem_to_hbm [thread:$0]  (%p816_p9), %s391_s3, 64, %s388_s30, %s377_s4  }
 0x290 PF: > { %s402_s27 = sand.u32 1, %s719_s9   ;;  %p960_p3 = scmp.ge.s32.totalorder %s739_s14, 2 }
 0x291   : > { %s403_s21 = scalar_lea.sflag [#allocation7], %s402_s27 }
 0x292   : > { %p531_p13 = pnand %p960_p3, %p823_p11 }
 0x294   : > { %p532_p5 = pneg %p531_p13 }
 0x296   : > { %714 = dma.done.wait (%p532_p5), %s403_s21, 64  }
 0x297   : > { %716 = vsyncadd (%p532_p5), %s403_s21, 4294967232  ;;  %s21_s14 = sadd.s32 1, %s739_s14   ;;  %s961_s9 = smov %s723_s10 }
 0x298   : > { %p18_p12 = scmp.ge.s32.totalorder %s21_s14, 4   ;;  %s962_s10 = smov %s727_s11 }
 0x299   : > { %s963_s11 = smov %s821_s23  ;;  %s964_s12 = smov %s735_s13 }
 0x29a   : > { %s965_s13 = smov %s967_s17  ;;  %20 = sbr.rel (!%p18_p12) target bundleno = 8 (0x8), region = 94 }
 0x29f   :  { %408 = vsyncpa [#allocation6], 1 }
 0x2a0   :  { %410 = vsyncpa [#allocation6 + $0x1], 1 }
 0x2a1   :  { %411 = vsyncpa [#allocation9], 1 }
 0x2a2   :  { %413 = vsyncpa [#allocation9 + $0x1], 1 }
 0x2a3   :  { %414 = vsyncpa [#allocation7], 1 }
 0x2a4   :  { %416 = vsyncpa [#allocation7 + $0x1], 1 }

</bundles_post_ra>
